<compile_context>
chip_gen: v7x
topology: tpu7x:2x2x1
jax: 0.10.0
libtpu: 0.0.40
codegen_flags: <defaults>
</compile_context>

<pallas_src>
import functools
import math

import jax
import jax.numpy as jnp
from jax.experimental import pallas as pl
from jax.experimental.pallas import tpu as pltpu


DTYPE_ACT = jnp.bfloat16
_MAX_ROW_TILE = 1024
_LN_EPS = 1e-6
_NEG_INF = -1e9

_PARALLEL1 = pltpu.CompilerParams(dimension_semantics=("parallel",))


def _round_up(x, m):
    return (x + m - 1) // m * m


def _row_tiling(M):
    tile = min(_MAX_ROW_TILE, _round_up(M, 8))
    Mp = _round_up(M, tile)
    return tile, Mp


def _agent_group(BA, L):
    """Agents per attention grid step (amortize per-step overhead)."""
    G = max(8, min(64, 256 // max(L, 1)))
    G = min(G, _round_up(BA, 8))
    BAp = _round_up(BA, G)
    return G, BAp


def _pad_rows(x2, Mp):
    M = x2.shape[0]
    if Mp != M:
        x2 = jnp.pad(x2, ((0, Mp - M), (0, 0)))
    return x2


# ----------------------------- kernel bodies -----------------------------

def _ln_f32(x, g, b, eps):
    """Annotated-transformer LayerNorm (unbiased std, eps added to std)."""
    d = x.shape[-1]
    mu = jnp.mean(x, axis=-1, keepdims=True)
    var = jnp.sum((x - mu) ** 2, axis=-1, keepdims=True) * (1.0 / (d - 1))
    inv = 1.0 / (jnp.sqrt(var) + eps)   # exact: LN rescales the residual stream
    return g * (x - mu) * inv + b


def _attend(q_slab, q_off, k_slab, k_off, v_slab, v_off, bias, wo_ref, h, d):
    """Batched MHA over G agents; heads via static slices of bf16 slabs.

    q_slab: (G, Lq, *) bf16; k_slab/v_slab: (G, Lk, *) bf16; bias: (G,1,Lk) f32
    or None.  Returns f32 (G*Lq, d) = sum_i softmax(Q_i K_i^T + bias) V_i @ Wo_i.
    """
    G, Lq = q_slab.shape[0], q_slab.shape[1]
    dk = d // h
    acc = None
    for i in range(h):
        qh = q_slab[:, :, q_off + i * dk:q_off + (i + 1) * dk]
        kh = k_slab[:, :, k_off + i * dk:k_off + (i + 1) * dk]
        vh = v_slab[:, :, v_off + i * dk:v_off + (i + 1) * dk]
        s = jnp.einsum('gqd,gkd->gqk', qh, kh,
                       preferred_element_type=jnp.float32)            # (G,Lq,Lk)
        if bias is not None:
            s = s + bias
        m = jnp.max(s, axis=-1, keepdims=True)
        e = jnp.exp(s - m)
        p = e * pl.reciprocal(jnp.sum(e, axis=-1, keepdims=True), approx=True)
        ctx = jnp.einsum('gqk,gkd->gqd', p.astype(jnp.bfloat16), vh,
                         preferred_element_type=jnp.float32)           # (G,Lq,dk)
        part = jnp.dot(ctx.reshape(G * Lq, dk).astype(jnp.bfloat16),
                       wo_ref[i * dk:(i + 1) * dk, :],
                       preferred_element_type=jnp.float32)             # (G*Lq,d)
        acc = part if acc is None else acc + part
    return acc


def _self_attn_kernel(*refs, h, masked, eps):
    """Fused pre-norm self-attention sublayer: x + Wo(MHA(LN(x)))."""
    if masked:
        (x_ref, bias_ref, g_ref, bt_ref, wqkv_ref, bqkv_ref,
         wo_ref, bo_ref, o_ref) = refs
    else:
        (x_ref, g_ref, bt_ref, wqkv_ref, bqkv_ref,
         wo_ref, bo_ref, o_ref) = refs
        bias_ref = None
    G, L, d = x_ref.shape
    x = x_ref[...].astype(jnp.float32)                                 # (G,L,d)
    xn = _ln_f32(x, g_ref[...], bt_ref[...], eps)
    xn2 = xn.reshape(G * L, d).astype(jnp.bfloat16)
    qkv = (jnp.dot(xn2, wqkv_ref[...], preferred_element_type=jnp.float32)
           + bqkv_ref[...]).astype(jnp.bfloat16).reshape(G, L, 3 * d)
    bias = bias_ref[...].astype(jnp.float32) if masked else None       # (G,1,L)
    acc = _attend(qkv, 0, qkv, d, qkv, 2 * d, bias, wo_ref, h, d)      # (G*L,d)
    res = x.reshape(G * L, d) + acc + bo_ref[...]
    o_ref[...] = res.reshape(G, L, d).astype(o_ref.dtype)


def _cross_attn_kernel(y_ref, kv_ref, bias_ref, g_ref, bt_ref, wq_ref, bq_ref,
                       wo_ref, bo_ref, o_ref, *, h, eps):
    """Fused pre-norm cross-attention sublayer: y + Wo(MHA(LN(y), memory))."""
    G, Lq, d = y_ref.shape
    y = y_ref[...].astype(jnp.float32)
    yn = _ln_f32(y, g_ref[...], bt_ref[...], eps)
    q = (jnp.dot(yn.reshape(G * Lq, d).astype(jnp.bfloat16), wq_ref[...],
                 preferred_element_type=jnp.float32)
         + bq_ref[...]).astype(jnp.bfloat16).reshape(G, Lq, d)
    kv = kv_ref[...]                                                    # bf16
    bias = bias_ref[...].astype(jnp.float32)
    acc = _attend(q, 0, kv, 0, kv, d, bias, wo_ref, h, d)
    res = y.reshape(G * Lq, d) + acc + bo_ref[...]
    o_ref[...] = res.reshape(G, Lq, d).astype(o_ref.dtype)


def _dense_kernel(x_ref, w_ref, b_ref, o_ref, *, scale):
    acc = jnp.dot(x_ref[...], w_ref[...], preferred_element_type=jnp.float32)
    o_ref[...] = ((acc + b_ref[...]) * scale).astype(o_ref.dtype)


def _ln_ffn_res_kernel(x_ref, g_ref, bt_ref, w1_ref, b1_ref, w2_ref, b2_ref,
                       o_ref, *, eps):
    x = x_ref[...].astype(jnp.float32)
    xn = _ln_f32(x, g_ref[...], bt_ref[...], eps).astype(jnp.bfloat16)
    hmid = jnp.dot(xn, w1_ref[...], preferred_element_type=jnp.float32) + b1_ref[...]
    hmid = jnp.maximum(hmid, 0.0).astype(jnp.bfloat16)
    y = jnp.dot(hmid, w2_ref[...], preferred_element_type=jnp.float32) + b2_ref[...]
    o_ref[...] = (x + y).astype(o_ref.dtype)


def _ln_kernel(x_ref, g_ref, bt_ref, o_ref, *, eps):
    x = x_ref[...].astype(jnp.float32)
    o_ref[...] = _ln_f32(x, g_ref[...], bt_ref[...], eps).astype(o_ref.dtype)


def _head_kernel(x_ref, sel_ref, w1_ref, b1_ref, w2_ref, b2_ref, o_ref):
    """3 dense reg|cls banks over the row tile, per-row one-hot select."""
    x = x_ref[...]                                    # (tile, d) bf16
    sel = sel_ref[...]                                # (tile, 3) f32 one-hot
    acc = jnp.zeros(o_ref.shape, jnp.float32)         # (tile, Npad)
    for t in range(3):
        hmid = jnp.dot(x, w1_ref[t], preferred_element_type=jnp.float32) + b1_ref[t]
        hmid = jnp.maximum(hmid, 0.0).astype(jnp.bfloat16)
        y = jnp.dot(hmid, w2_ref[t], preferred_element_type=jnp.float32) + b2_ref[t]
        acc = acc + sel[:, t:t + 1] * y
    o_ref[...] = acc


# ----------------------------- kernel wrappers -----------------------------

def dense(x, w, b, scale=1.0):
    """(x @ w + b) * scale, row-tiled, bf16 in / bf16 out, f32 accumulate."""
    orig = x.shape
    K = orig[-1]
    N = w.shape[1]
    x2 = x.reshape(-1, K).astype(DTYPE_ACT)
    M = x2.shape[0]
    tile, Mp = _row_tiling(M)
    x2 = _pad_rows(x2, Mp)
    out = pl.pallas_call(
        functools.partial(_dense_kernel, scale=scale),
        out_shape=jax.ShapeDtypeStruct((Mp, N), DTYPE_ACT),
        grid=(Mp // tile,),
        in_specs=[pl.BlockSpec((tile, K), lambda i: (i, 0)),
                  pl.BlockSpec((K, N), lambda i: (0, 0)),
                  pl.BlockSpec((1, N), lambda i: (0, 0))],
        out_specs=pl.BlockSpec((tile, N), lambda i: (i, 0)),
        compiler_params=_PARALLEL1,
    )(x2, w, b)
    if Mp != M:
        out = out[:M]
    return out.reshape(*orig[:-1], N)


def ln_ffn_res(x, p, eps=_LN_EPS):
    """x + Linear(ReLU(Linear(LayerNorm(x)))) fused; row-tiled."""
    orig = x.shape
    d = orig[-1]
    H = p['w1'].shape[1]
    x2 = x.reshape(-1, d).astype(DTYPE_ACT)
    M = x2.shape[0]
    tile, Mp = _row_tiling(M)
    x2 = _pad_rows(x2, Mp)
    out = pl.pallas_call(
        functools.partial(_ln_ffn_res_kernel, eps=eps),
        out_shape=jax.ShapeDtypeStruct((Mp, d), DTYPE_ACT),
        grid=(Mp // tile,),
        in_specs=[pl.BlockSpec((tile, d), lambda i: (i, 0)),
                  pl.BlockSpec((1, d), lambda i: (0, 0)),
                  pl.BlockSpec((1, d), lambda i: (0, 0)),
                  pl.BlockSpec((d, H), lambda i: (0, 0)),
                  pl.BlockSpec((1, H), lambda i: (0, 0)),
                  pl.BlockSpec((H, d), lambda i: (0, 0)),
                  pl.BlockSpec((1, d), lambda i: (0, 0))],
        out_specs=pl.BlockSpec((tile, d), lambda i: (i, 0)),
        compiler_params=_PARALLEL1,
    )(x2, p['ln_g'], p['ln_b'], p['w1'], p['b1'], p['w2'], p['b2'])
    if Mp != M:
        out = out[:M]
    return out.reshape(orig)


def layer_norm(x, g, b, eps=_LN_EPS):
    orig = x.shape
    d = orig[-1]
    x2 = x.reshape(-1, d).astype(DTYPE_ACT)
    M = x2.shape[0]
    tile, Mp = _row_tiling(M)
    x2 = _pad_rows(x2, Mp)
    out = pl.pallas_call(
        functools.partial(_ln_kernel, eps=eps),
        out_shape=jax.ShapeDtypeStruct((Mp, d), DTYPE_ACT),
        grid=(Mp // tile,),
        in_specs=[pl.BlockSpec((tile, d), lambda i: (i, 0)),
                  pl.BlockSpec((1, d), lambda i: (0, 0)),
                  pl.BlockSpec((1, d), lambda i: (0, 0))],
        out_specs=pl.BlockSpec((tile, d), lambda i: (i, 0)),
        compiler_params=_PARALLEL1,
    )(x2, g, b)
    if Mp != M:
        out = out[:M]
    return out.reshape(orig)


def self_attention_block(x, bias, p, h, masked=True):
    """Fused pre-norm self-attn sublayer, G agents per grid step.

    x: (B, A, L, d); bias: (B*A, 1, L) bf16 additive mask (or None if not masked).
    """
    B, A, L, d = x.shape
    BA = B * A
    G, BAp = _agent_group(BA, L)
    x3 = x.reshape(BA, L, d).astype(DTYPE_ACT)
    if BAp != BA:
        x3 = jnp.pad(x3, ((0, BAp - BA), (0, 0), (0, 0)))
    args = [x3]
    in_specs = [pl.BlockSpec((G, L, d), lambda g: (g, 0, 0))]
    if masked:
        b3 = bias
        if BAp != BA:
            b3 = jnp.pad(b3, ((0, BAp - BA), (0, 0), (0, 0)))
        args.append(b3)
        in_specs.append(pl.BlockSpec((G, 1, L), lambda g: (g, 0, 0)))
    args += [p['ln_g'], p['ln_b'], p['wqkv'], p['bqkv'], p['wo'], p['bo']]
    in_specs += [pl.BlockSpec((1, d), lambda g: (0, 0)),
                 pl.BlockSpec((1, d), lambda g: (0, 0)),
                 pl.BlockSpec((d, 3 * d), lambda g: (0, 0)),
                 pl.BlockSpec((1, 3 * d), lambda g: (0, 0)),
                 pl.BlockSpec((d, d), lambda g: (0, 0)),
                 pl.BlockSpec((1, d), lambda g: (0, 0))]
    out = pl.pallas_call(
        functools.partial(_self_attn_kernel, h=h, masked=masked, eps=_LN_EPS),
        out_shape=jax.ShapeDtypeStruct((BAp, L, d), DTYPE_ACT),
        grid=(BAp // G,),
        in_specs=in_specs,
        out_specs=pl.BlockSpec((G, L, d), lambda g: (g, 0, 0)),
        compiler_params=_PARALLEL1,
    )(*args)
    if BAp != BA:
        out = out[:BA]
    return out.reshape(B, A, L, d)


def cross_attention_block(y, mem_kv, bias, p, h):
    """Fused pre-norm cross-attn sublayer, G agents per grid step.

    y: (B, A, Lq, d); mem_kv: (B*A, Lk, 2d) bf16; bias: (B*A, 1, Lk) bf16.
    """
    B, A, Lq, d = y.shape
    BA = B * A
    Lk = mem_kv.shape[1]
    G, BAp = _agent_group(BA, Lk)
    y3 = y.reshape(BA, Lq, d).astype(DTYPE_ACT)
    kv3 = mem_kv
    b3 = bias
    if BAp != BA:
        y3 = jnp.pad(y3, ((0, BAp - BA), (0, 0), (0, 0)))
        kv3 = jnp.pad(kv3, ((0, BAp - BA), (0, 0), (0, 0)))
        b3 = jnp.pad(b3, ((0, BAp - BA), (0, 0), (0, 0)))
    out = pl.pallas_call(
        functools.partial(_cross_attn_kernel, h=h, eps=_LN_EPS),
        out_shape=jax.ShapeDtypeStruct((BAp, Lq, d), DTYPE_ACT),
        grid=(BAp // G,),
        in_specs=[pl.BlockSpec((G, Lq, d), lambda g: (g, 0, 0)),
                  pl.BlockSpec((G, Lk, 2 * d), lambda g: (g, 0, 0)),
                  pl.BlockSpec((G, 1, Lk), lambda g: (g, 0, 0)),
                  pl.BlockSpec((1, d), lambda g: (0, 0)),
                  pl.BlockSpec((1, d), lambda g: (0, 0)),
                  pl.BlockSpec((d, d), lambda g: (0, 0)),
                  pl.BlockSpec((1, d), lambda g: (0, 0)),
                  pl.BlockSpec((d, d), lambda g: (0, 0)),
                  pl.BlockSpec((1, d), lambda g: (0, 0))],
        out_specs=pl.BlockSpec((G, Lq, d), lambda g: (g, 0, 0)),
        compiler_params=_PARALLEL1,
    )(y3, kv3, b3, p['ln_g'], p['ln_b'], p['wq'], p['bq'], p['wo'], p['bo'])
    if BAp != BA:
        out = out[:BA]
    return out.reshape(B, A, Lq, d)


def choice_head(x, obj_type, hp, out_dims):
    """Packed 3-type head bank: 3 dense banks + per-row one-hot select.

    x: (B, P, prop, d); obj_type: (B, P) waymo types in {1,2,3}.
    """
    # TODO(synk): ChoiceHead source is not in the provided snippet; a standard
    # 3-type (vehicle/pedestrian/cyclist) reg/cls 2-layer-MLP bank selected by
    # obj_type is implemented here.
    B, P, prop, d = x.shape
    Npad = hp['w2'].shape[-1]
    M = B * P * prop
    x2 = x.reshape(M, d).astype(DTYPE_ACT)
    tsel = jnp.clip(obj_type.astype(jnp.int32) - 1, 0, 2)            # (B, P)
    sel = jax.nn.one_hot(tsel, 3, dtype=jnp.float32)                 # (B, P, 3)
    sel = jnp.broadcast_to(sel[:, :, None, :], (B, P, prop, 3)).reshape(M, 3)
    tile, Mp = _row_tiling(M)
    x2 = _pad_rows(x2, Mp)
    sel = _pad_rows(sel, Mp)
    out = pl.pallas_call(
        _head_kernel,
        out_shape=jax.ShapeDtypeStruct((Mp, Npad), jnp.float32),
        grid=(Mp // tile,),
        in_specs=[pl.BlockSpec((tile, d), lambda i: (i, 0)),
                  pl.BlockSpec((tile, 3), lambda i: (i, 0)),
                  pl.BlockSpec((3, d, 2 * d), lambda i: (0, 0, 0)),
                  pl.BlockSpec((3, 1, 2 * d), lambda i: (0, 0, 0)),
                  pl.BlockSpec((3, 2 * d, Npad), lambda i: (0, 0, 0)),
                  pl.BlockSpec((3, 1, Npad), lambda i: (0, 0, 0))],
        out_specs=pl.BlockSpec((tile, Npad), lambda i: (i, 0)),
        compiler_params=_PARALLEL1,
    )(x2, sel, hp['w1'], hp['b1'], hp['w2'], hp['b2'])
    out = out[:M].reshape(B, P, prop, Npad)
    coord = out[..., :out_dims]
    cls = out[..., out_dims]
    return coord, cls


# ----------------------------- parameter setup -----------------------------

def _init_linear(key, fan_in, fan_out):
    w = jax.random.normal(key, (fan_in, fan_out), jnp.float32) * 0.02
    b = jnp.zeros((fan_out,), jnp.float32)
    return w, b


def _init_self_attn(key, d, h):
    dk = d // h
    scale = 1.0 / math.sqrt(dk)
    kq, kk, kv, ko = jax.random.split(key, 4)
    wq, bq = _init_linear(kq, d, d)
    wk, bk = _init_linear(kk, d, d)
    wv, bv = _init_linear(kv, d, d)
    wo, bo = _init_linear(ko, d, d)
    # fold 1/sqrt(dk) into the Q projection; fuse Q|K|V into one matmul.
    wqkv = jnp.concatenate([wq * scale, wk, wv], axis=1)
    bqkv = jnp.concatenate([bq * scale, bk, bv], axis=0)
    return {'ln_g': jnp.ones((1, d), jnp.float32),
            'ln_b': jnp.zeros((1, d), jnp.float32),
            'wqkv': wqkv.astype(jnp.bfloat16),
            'bqkv': bqkv.reshape(1, 3 * d),
            'wo': wo.astype(jnp.bfloat16),
            'bo': bo.reshape(1, d)}


def _init_cross_attn(key, d, h):
    dk = d // h
    scale = 1.0 / math.sqrt(dk)
    kq, kk, kv, ko = jax.random.split(key, 4)
    wq, bq = _init_linear(kq, d, d)
    wk, bk = _init_linear(kk, d, d)
    wv, bv = _init_linear(kv, d, d)
    wo, bo = _init_linear(ko, d, d)
    return {'ln_g': jnp.ones((1, d), jnp.float32),
            'ln_b': jnp.zeros((1, d), jnp.float32),
            'wq': (wq * scale).astype(jnp.bfloat16),
            'bq': (bq * scale).reshape(1, d),
            'wkv': jnp.concatenate([wk, wv], axis=1).astype(jnp.bfloat16),
            'bkv': jnp.concatenate([bk, bv], axis=0).reshape(1, 2 * d),
            'wo': wo.astype(jnp.bfloat16),
            'bo': bo.reshape(1, d)}


def _init_ff(key, d, d_hidden):
    k1, k2 = jax.random.split(key)
    w1, b1 = _init_linear(k1, d, d_hidden)
    w2, b2 = _init_linear(k2, d_hidden, d)
    return {'ln_g': jnp.ones((1, d), jnp.float32),
            'ln_b': jnp.zeros((1, d), jnp.float32),
            'w1': w1.astype(jnp.bfloat16), 'b1': b1.reshape(1, d_hidden),
            'w2': w2.astype(jnp.bfloat16), 'b2': b2.reshape(1, d)}


def _init_head(key, d, out_dims):
    """Pack the 3-type reg/cls MLPs: fused first layer, lane-dense second."""
    Npad = max(128, _round_up(out_dims + 1, 128))
    keys = iter(jax.random.split(key, 12))
    w1s, b1s, w2s, b2s = [], [], [], []
    for _ in range(3):
        rw1, rb1 = _init_linear(next(keys), d, d)
        rw2, rb2 = _init_linear(next(keys), d, out_dims)
        cw1, cb1 = _init_linear(next(keys), d, d)
        cw2, cb2 = _init_linear(next(keys), d, 1)
        w1 = jnp.concatenate([rw1, cw1], axis=1)                     # (d, 2d)
        b1 = jnp.concatenate([rb1, cb1], axis=0).reshape(1, 2 * d)
        w2 = jnp.zeros((2 * d, Npad), jnp.float32)
        w2 = w2.at[:d, :out_dims].set(rw2)
        w2 = w2.at[d:, out_dims:out_dims + 1].set(cw2)
        b2 = jnp.zeros((1, Npad), jnp.float32)
        b2 = b2.at[0, :out_dims].set(rb2)
        b2 = b2.at[0, out_dims].set(cb2[0])
        w1s.append(w1.astype(jnp.bfloat16)); b1s.append(b1)
        w2s.append(w2.astype(jnp.bfloat16)); b2s.append(b2)
    return {'w1': jnp.stack(w1s), 'b1': jnp.stack(b1s),
            'w2': jnp.stack(w2s), 'b2': jnp.stack(b2s)}


def _positional_encoding(max_len, d):
    pos = jnp.arange(max_len, dtype=jnp.float32)[:, None]
    div = jnp.exp(jnp.arange(0, d, 2, dtype=jnp.float32) * (-math.log(10000.0) / d))
    pe = jnp.zeros((max_len, d), jnp.float32)
    pe = pe.at[:, 0::2].set(jnp.sin(pos * div))
    pe = pe.at[:, 1::2].set(jnp.cos(pos * div))
    return pe


def init_params(key, cfg, max_len):
    d = cfg['d_model']
    h = cfg['attention_head']
    N = cfg['model_layers_num']
    keys = iter(jax.random.split(key, 5 * N + 8))
    params = {}
    params['query_embed'] = jax.nn.initializers.orthogonal()(
        next(keys), (cfg['prop_num'], d), jnp.float32)
    ew, eb = _init_linear(next(keys), cfg['traj_dims'], d)
    params['embed_w'] = ew.astype(jnp.bfloat16)
    params['embed_b'] = eb.reshape(1, d)
    params['pe'] = _positional_encoding(_round_up(max_len, 8), d)

    enc_layers, dec_layers = [], []
    for _ in range(N):
        enc_layers.append({'self_attn': _init_self_attn(next(keys), d, h),
                           'ff': _init_ff(next(keys), d, 2 * d)})
    for _ in range(N):
        dec_layers.append({'self_attn': _init_self_attn(next(keys), d, h),
                           'src_attn': _init_cross_attn(next(keys), d, h),
                           'ff': _init_ff(next(keys), d, 2 * d)})
    params['enc_layers'] = enc_layers
    params['dec_layers'] = dec_layers
    params['enc_norm_g'] = jnp.ones((1, d), jnp.float32)
    params['enc_norm_b'] = jnp.zeros((1, d), jnp.float32)
    params['dec_norm_g'] = jnp.ones((1, d), jnp.float32)
    params['dec_norm_b'] = jnp.zeros((1, d), jnp.float32)
    params['head'] = _init_head(next(keys), d, cfg['out_dims'])
    return params


# ----------------------------- model forward -----------------------------

def _bool2index(mask):
    A = mask.shape[-1]
    seq = jnp.arange(A, dtype=jnp.int32)
    index = jnp.where(mask > 0, seq, 1000)
    index = jnp.sort(index, axis=-1)
    gmask = index < 1000
    index = jnp.where(index == 1000, 0, index).astype(jnp.int32)
    return index, gmask


def _gather_agents(x, idx):
    """x:(B, A, ...), idx:(B, P) -> (B, P, ...) (torch.gather along dim 1)."""
    extra = x.shape[2:]
    idx_full = idx.reshape(idx.shape + (1,) * len(extra))
    idx_full = jnp.broadcast_to(idx_full, idx.shape + extra)
    return jnp.take_along_axis(x, idx_full, axis=1)


def _gather_new_data(data, max_agent, agent_valid, max_pred_num):
    ttp = data['tracks_to_predict'][:, :max_agent]
    # mask out bucket-padding agents so semantics match the true max_agent
    ttp = ttp * agent_valid.astype(ttp.dtype)
    gather_list, gather_mask = _bool2index(ttp)
    gather_list = gather_list[:, :max_pred_num]
    gather_mask = gather_mask[:, :max_pred_num]

    obj_type = _gather_agents(data['obj_type'].astype(jnp.int32)[:, :max_agent],
                              gather_list)
    gt = _gather_agents(data['gt'][:, :max_agent], gather_list)
    gt_mask = _gather_agents(data['gt_mask'][:, :max_agent], gather_list)
    misc = _gather_agents(data['misc'][:, :max_agent], gather_list)
    centroid = _gather_agents(data['centroid'][:, :max_agent], gather_list)

    new_data = {'gt': gt, 'gt_mask': gt_mask, 'tracks_to_predict': gather_mask,
                'misc': misc, 'obj_type': obj_type, 'centroid': centroid}
    return gather_list, new_data


def stf_forward(params, data, cfg):
    max_pred_num = cfg['max_pred_num']
    h = cfg['attention_head']
    d_model = cfg['d_model']
    prop_num = cfg['prop_num']
    out_dims = cfg['out_dims']

    valid_len = data['valid_len']
    A_total = data['hist'].shape[1]
    # Host-side resolution of the data-dependent agent count, rounded up to a
    # bucket (multiple of 8) so distinct compiles are bounded; a traced column
    # mask below preserves the exact un-bucketed gather semantics.
    max_agent_true = max(int(jnp.max(valid_len[:, 0])), max_pred_num)
    max_agent = min(_round_up(max_agent_true, 8), A_total)
    agent_valid = (jnp.arange(max_agent)[None, :]
                   < jnp.maximum(jnp.max(valid_len[:, 0]), max_pred_num))

    hist = data['hist'][:, :max_agent]                       # (B, A, T, traj)
    hist_mask = data['hist_mask'][:, :max_agent]             # (B, A, T)
    B, A, T, _ = hist.shape
    BA = B * A

    # Pad time to a sublane multiple; padded keys are masked out below.
    Tp = _round_up(T, 8)
    if Tp != T:
        hist = jnp.pad(hist, ((0, 0), (0, 0), (0, Tp - T), (0, 0)))
        hist_mask = jnp.pad(hist_mask, ((0, 0), (0, 0), (0, Tp - T)))
    prop_pad = _round_up(prop_num, 8)

    # Additive attention biases, pre-converted on host and stored in bf16.
    bias_src = jnp.where(hist_mask.reshape(BA, 1, Tp) > 0, 0.0, _NEG_INF)
    bias_src = bias_src.astype(DTYPE_ACT)
    dec_masked = prop_pad != prop_num                # tgt_mask=None in the ref
    if dec_masked:
        kv_valid = jnp.arange(prop_pad) < prop_num
        bias_dec = jnp.where(kv_valid, 0.0, _NEG_INF).astype(DTYPE_ACT)
        bias_dec = jnp.broadcast_to(bias_dec[None, None, :], (BA, 1, prop_pad))
    else:
        bias_dec = None

    # ---- src embedding: LinearEmbedding * sqrt(d_model) + PositionalEncoding
    x = dense(hist, params['embed_w'], params['embed_b'], scale=math.sqrt(d_model))
    x = (x.astype(jnp.float32) + params['pe'][:Tp][None, None]).astype(DTYPE_ACT)

    # ---- encoder (fused pre-norm sublayers, final LN)
    for lp in params['enc_layers']:
        x = self_attention_block(x, bias_src, lp['self_attn'], h, masked=True)
        x = ln_ffn_res(x, lp['ff'])
    memory = layer_norm(x, params['enc_norm_g'], params['enc_norm_b'])

    # ---- decoder (queries attend to encoded history)
    qe = params['query_embed']
    if prop_pad != prop_num:
        qe = jnp.pad(qe, ((0, prop_pad - prop_num), (0, 0)))
    y = jnp.broadcast_to(qe[None, None], (B, A, prop_pad, d_model)).astype(DTYPE_ACT)
    for lp in params['dec_layers']:
        mem_kv = dense(memory, lp['src_attn']['wkv'], lp['src_attn']['bkv'])
        mem_kv = mem_kv.reshape(BA, Tp, 2 * d_model)
        y = self_attention_block(y, bias_dec, lp['self_attn'], h,
                                 masked=dec_masked)
        y = cross_attention_block(y, mem_kv, bias_src, lp['src_attn'], h)
        y = ln_ffn_res(y, lp['ff'])
    hist_out = layer_norm(y, params['dec_norm_g'], params['dec_norm_b'])
    hist_out = hist_out[:, :, :prop_num]                     # drop prop padding

    # ---- gather predicted agents and run prediction head
    gather_list, new_data = _gather_new_data(data, max_agent, agent_valid,
                                             max_pred_num)
    hist_out = _gather_agents(hist_out, gather_list)         # (B, P, prop, d)
    outputs_coord, outputs_class = choice_head(hist_out, new_data['obj_type'],
                                               params['head'], out_dims)
    return outputs_coord, outputs_class, new_data


# ----------------------------- demo -----------------------------

if __name__ == "__main__":
    cfg = dict(max_pred_num=4, prop_num=6, d_model=32, attention_head=2,
               dropout=0.0, model_layers_num=1, traj_dims=4, out_dims=8)

    key = jax.random.PRNGKey(0)
    B, A_total, T, T_fut = 2, 8, 8, 6

    kp, kd = jax.random.split(key)
    params = init_params(kp, cfg, max_len=T)

    dkeys = jax.random.split(kd, 8)
    data = {
        'valid_len': jnp.array([[6, T], [5, T]], dtype=jnp.int32),
        'hist': jax.random.normal(dkeys[0], (B, A_total, T, cfg['traj_dims']), jnp.float32),
        'hist_mask': (jax.random.uniform(dkeys[1], (B, A_total, T)) > 0.2).astype(jnp.float32),
        'tracks_to_predict': (jax.random.uniform(dkeys[2], (B, A_total)) > 0.5).astype(jnp.int32),
        'obj_type': jax.random.randint(dkeys[3], (B, A_total), 1, 4),
        'gt': jax.random.normal(dkeys[4], (B, A_total, T_fut, 2), jnp.float32),
        'gt_mask': (jax.random.uniform(dkeys[5], (B, A_total, T_fut)) > 0.3).astype(jnp.float32),
        'misc': jax.random.normal(dkeys[6], (B, A_total, 5, 3), jnp.float32),
        'centroid': jax.random.normal(dkeys[7], (B, A_total, 2), jnp.float32),
    }

    outputs_coord, outputs_class, new_data = stf_forward(params, data, cfg)
    jax.block_until_ready((outputs_coord, outputs_class, new_data))
    assert outputs_coord.shape == (B, cfg['max_pred_num'], cfg['prop_num'], cfg['out_dims'])
    assert outputs_class.shape == (B, cfg['max_pred_num'], cfg['prop_num'])
    assert bool(jnp.all(jnp.isfinite(outputs_coord)))
    assert bool(jnp.all(jnp.isfinite(outputs_class)))
    print("KERNEL_OK")
</pallas_src>

<mosaic_0001>
module attributes {stable_mosaic.version = 11 : i64} {
  func.func @_dense_kernel(%arg0: i32, %arg1: memref<128x4xbf16, #tpu.memory_space<vmem>>, %arg2: memref<4x32xbf16, #tpu.memory_space<vmem>>, %arg3: memref<1x32xf32, #tpu.memory_space<vmem>>, %arg4: memref<128x32xbf16, #tpu.memory_space<vmem>>) attributes {dimension_semantics = [#tpu.dimension_semantics<parallel>], iteration_bounds = array<i64: 1>, scalar_prefetch = 0 : i64, scratch_operands = 0 : i64, tpu.core_type = #tpu.core_type<tc>, window_params = [{transform_indices = @transform_0, window_bounds = array<i64: 128, 4>}, {pipeline_mode = #tpu.pipeline_mode<synchronous>, transform_indices = @transform_1, window_bounds = array<i64: 4, 32>}, {pipeline_mode = #tpu.pipeline_mode<synchronous>, transform_indices = @transform_2, window_bounds = array<i64: 1, 32>}, {transform_indices = @transform_3, window_bounds = array<i64: 128, 32>}]} {
    %c0 = arith.constant 0 : index
    %c0_0 = arith.constant 0 : index
    %0 = vector.load %arg1[%c0, %c0_0] : memref<128x4xbf16, #tpu.memory_space<vmem>>, vector<128x4xbf16>
    %c0_1 = arith.constant 0 : index
    %c0_2 = arith.constant 0 : index
    %1 = vector.load %arg2[%c0_1, %c0_2] : memref<4x32xbf16, #tpu.memory_space<vmem>>, vector<4x32xbf16>
    %cst = arith.constant dense<0.000000e+00> : vector<128x32xf32>
    %2 = tpu.matmul %0, %1, %cst {dimension_numbers = #tpu.dot_dimension_numbers<[1], [0], [0], [1], [0, 0, 1, 1], [], []>} : vector<128x4xbf16>, vector<4x32xbf16>, vector<128x32xf32> -> vector<128x32xf32>
    %c0_3 = arith.constant 0 : index
    %c0_4 = arith.constant 0 : index
    %3 = vector.load %arg3[%c0_3, %c0_4] : memref<1x32xf32, #tpu.memory_space<vmem>>, vector<1x32xf32>
    %4 = vector.broadcast %3 : vector<1x32xf32> to vector<128x32xf32>
    %5 = arith.addf %2, %4 : vector<128x32xf32>
    %cst_5 = arith.constant 5.65685415 : f32
    %6 = vector.broadcast %cst_5 : f32 to vector<128x32xf32>
    %7 = arith.mulf %5, %6 : vector<128x32xf32>
    %8 = arith.truncf %7 : vector<128x32xf32> to vector<128x32xbf16>
    %c0_6 = arith.constant 0 : index
    %c0_7 = arith.constant 0 : index
    %9 = vector.load %arg4[%c0_6, %c0_7] : memref<128x32xbf16, #tpu.memory_space<vmem>>, vector<128x32xbf16>
    tpu.vector_store %arg4[%c0_6, %c0_7], %8 {strides = array<i32>} : memref<128x32xbf16, #tpu.memory_space<vmem>>, vector<128x32xbf16>,
    return
  }
  func.func @transform_0(%arg0: i32) -> (i32, i32) {
    %c0_i32 = arith.constant 0 : i32
    %c0_i32_0 = arith.constant 0 : i32
    return %arg0, %c0_i32 : i32, i32
  }
  func.func @transform_1(%arg0: i32) -> (i32, i32) {
    %c0_i32 = arith.constant 0 : i32
    %c0_i32_0 = arith.constant 0 : i32
    %c0_i32_1 = arith.constant 0 : i32
    return %c0_i32, %c0_i32_0 : i32, i32
  }
  func.func @transform_2(%arg0: i32) -> (i32, i32) {
    %c0_i32 = arith.constant 0 : i32
    %c0_i32_0 = arith.constant 0 : i32
    %c0_i32_1 = arith.constant 0 : i32
    return %c0_i32, %c0_i32_0 : i32, i32
  }
  func.func @transform_3(%arg0: i32) -> (i32, i32) {
    %c0_i32 = arith.constant 0 : i32
    %c0_i32_0 = arith.constant 0 : i32
    return %arg0, %c0_i32 : i32, i32
  }
}

</mosaic_0001>

<bundles_post_ra>
// kernel: tpu_custom_call.1
= control target key start
LH: loop header
LB: loop body
LE: loop exit
PB: predicated region body
PF: predicated region fallthrough
CT: control target
= control target key end

     0   :  { %vm104_vm0 = vcmask 1041408   ;;  %vm79_vm1 = vcmask 31744   ;;  %vm285_vm2 = vcmask 257024   ;;  %s534_s1 = inlined_call_operand.vmem [shape: bf16[4,32], index: 1, kind: input, shape index: {}]   ;;  %s535_s0 = inlined_call_operand.vmem [shape: bf16[128,4], index: 0, kind: input, shape index: {}]   ;;  %s536_s2 = inlined_call_operand.vmem [shape: f32[1,32], index: 2, kind: input, shape index: {}]   ;;  %s537_s3 = inlined_call_operand.vmem [shape: bf16[128,32], index: 3, kind: output, shape index: {}]  }
   0x1   :  { %v31_v0 = vld [vmem:[%s534_s1] sm:$0x3]  ;;  %v388_v4 = vld [vmem:[%s535_s0 + $0x8] sm:$0xff]   ;;  %v390_v6 = vld [vmem:[%s535_s0 + $0x10] sm:$0xff]  }
   0x2   :  { %384 = vmatprep.subr.msk.bf16.mxu0 %vm104_vm0, %v31_v0  ;;  %385 = vmatprep.subr.msk.bf16.mxu1 %vm104_vm0, %v31_v0  ;;  %v106_v1 = vsel %vm104_vm0, %v31_v0, 0  ;;  %v386_v2 = vld [vmem:[%s535_s0] sm:$0xff]   ;;  %v389_v5 = vld [vmem:[%s535_s0 + $0x28] sm:$0xff]   ;;  %v391_v7 = vld [vmem:[%s535_s0 + $0x30] sm:$0xff]  }
   0x3   :  { %365 = vmatpush3.bf16.msra.mxu0 %v106_v1  ;;  %383 = vmatpush3.bf16.msra.mxu1 %v106_v1  ;;  %v387_v3 = vld [vmem:[%s535_s0 + $0x20] sm:$0xff]   ;;  %v392_v8 = vld [vmem:[%s535_s0 + $0x18] sm:$0xff]  }
   0x4   :  { %366 = vmatprep.mubr.msk.bf16.mxu0 %vm79_vm1, %v386_v2  ;;  %374 = vmatprep.mubr.msk.bf16.mxu1 %vm79_vm1, %v387_v3  ;;  %v393_v9 = vld [vmem:[%s535_s0 + $0x38] sm:$0xff]   ;;  %v452_v10 = vld [vmem:[%s536_s2] ss:$0 sm:$0xff] }
   0x6   :  { %367 = vmatmul.mubr.msk.bf16.vlgmr.msra.gmra.mrb[0].mxu0 %vm79_vm1, %v388_v4  ;;  %375 = vmatmul.mubr.msk.bf16.vlgmr.msra.gmra.mrb[0].mxu1 %vm79_vm1, %v389_v5 }
   0x7   :  { %370 = vmatprep.mubr.msk.bf16.mxu0 %vm79_vm1, %v390_v6  ;;  %378 = vmatprep.mubr.msk.bf16.mxu1 %vm79_vm1, %v391_v7 }
   0xe   :  { %371 = vmatmul.mubr.msk.bf16.gmra.mrb[4].mxu0 %vm79_vm1, %v392_v8  ;;  %379 = vmatmul.mubr.msk.bf16.gmra.mrb[4].mxu1 %vm79_vm1, %v393_v9 }
  0xd9   :  { %v368_v11 = vpop.f32.mrb[0].mxu0  ;;  %v376_v13 = vpop.f32.mrb[0].mxu1 }
  0xda   :  { %v151_v12 = vadd.f32 %v368_v11, %v452_v10  ;;  %v142_v14 = vpop.f32.mrb[1].mxu0  ;;  %v183_v15 = vadd.f32 %v376_v13, %v452_v10  ;;  %v174_v17 = vpop.f32.mrb[1].mxu1 }
  0xdb   :  { %v143_v16 = vadd.f32 %v452_v10, %v142_v14  ;;  %v369_v18 = vpop.f32.mrb[2].mxu0  ;;  %v175_v20 = vadd.f32 %v452_v10, %v174_v17  ;;  %v377_v22 = vpop.f32.mrb[2].mxu1 }
  0xdc   :  { %v207_v19 = vmul.f32 5.656854, %v151_v12  ;;  %v154_v21 = vadd.f32 %v369_v18, %v452_v10  ;;  %v145_v23 = vpop.f32.mrb[3].mxu0  ;;  %v215_v24 = vmul.f32 5.656854, %v183_v15  ;;  %v186_v26 = vadd.f32 %v377_v22, %v452_v10  ;;  %v177_v28 = vpop.f32.mrb[3].mxu1 }
  0xdd   :  { %v205_v25 = vmul.f32 5.656854, %v143_v16  ;;  %v146_v27 = vadd.f32 %v452_v10, %v145_v23  ;;  %v213_v30 = vmul.f32 5.656854, %v175_v20  ;;  %v178_v32 = vadd.f32 %v452_v10, %v177_v28 }
  0xde   :  { %v341_v29 = vpack.c.bf16 %v207_v19, %v207_v19  ;;  %v208_v31 = vmul.f32 5.656854, %v154_v21  ;;  %v349_v33 = vpack.c.bf16 %v215_v24, %v215_v24  ;;  %v216_v35 = vmul.f32 5.656854, %v186_v26 }
  0xdf   :  { %v339_v34 = vpack.c.bf16 %v205_v25, %v205_v25  ;;  %v206_v36 = vmul.f32 5.656854, %v146_v27  ;;  %v347_v37 = vpack.c.bf16 %v213_v30, %v213_v30  ;;  %v214_v39 = vmul.f32 5.656854, %v178_v32 }
  0xe0   :  { %288 = vst.msk [vmem:[%s537_s3 + $0x8] sm:$0xf] %vm285_vm2, %v341_v29  ;;  %v342_v38 = vpack.c.bf16 %v208_v31, %v208_v31  ;;  %296 = vst.msk [vmem:[%s537_s3 + $0x28] sm:$0xf] %vm285_vm2, %v349_v33  ;;  %v350_v40 = vpack.c.bf16 %v216_v35, %v216_v35 }
  0xe1   :  { %286 = vst.msk [vmem:[%s537_s3] sm:$0xf] %vm285_vm2, %v339_v34  ;;  %v340_v41 = vpack.c.bf16 %v206_v36, %v206_v36  ;;  %v372_v42 = vpop.f32.mrb[4].mxu0  ;;  %294 = vst.msk [vmem:[%s537_s3 + $0x20] sm:$0xf] %vm285_vm2, %v347_v37  ;;  %v348_v43 = vpack.c.bf16 %v214_v39, %v214_v39  ;;  %v380_v45 = vpop.f32.mrb[4].mxu1 }
  0xe2   :  { %289 = vst.msk [vmem:[%s537_s3 + $0xc] sm:$0xf] %vm285_vm2, %v342_v38  ;;  %v167_v44 = vadd.f32 %v372_v42, %v452_v10  ;;  %v158_v46 = vpop.f32.mrb[5].mxu0  ;;  %297 = vst.msk [vmem:[%s537_s3 + $0x2c] sm:$0xf] %vm285_vm2, %v350_v40  ;;  %v199_v47 = vadd.f32 %v380_v45, %v452_v10  ;;  %v190_v49 = vpop.f32.mrb[5].mxu1 }
  0xe3   :  { %287 = vst.msk [vmem:[%s537_s3 + $0x4] sm:$0xf] %vm285_vm2, %v340_v41  ;;  %v159_v48 = vadd.f32 %v452_v10, %v158_v46  ;;  %v373_v50 = vpop.f32.mrb[6].mxu0  ;;  %295 = vst.msk [vmem:[%s537_s3 + $0x24] sm:$0xf] %vm285_vm2, %v348_v43  ;;  %v191_v52 = vadd.f32 %v452_v10, %v190_v49  ;;  %v381_v54 = vpop.f32.mrb[6].mxu1 }
  0xe4   :  { %v211_v51 = vmul.f32 5.656854, %v167_v44  ;;  %v170_v53 = vadd.f32 %v373_v50, %v452_v10  ;;  %v161_v55 = vpop.f32.mrb[7].mxu0  ;;  %v219_v56 = vmul.f32 5.656854, %v199_v47  ;;  %v202_v58 = vadd.f32 %v381_v54, %v452_v10  ;;  %v193_v60 = vpop.f32.mrb[7].mxu1 }
  0xe5   :  { %v209_v57 = vmul.f32 5.656854, %v159_v48  ;;  %v162_v59 = vadd.f32 %v452_v10, %v161_v55  ;;  %v217_v62 = vmul.f32 5.656854, %v191_v52  ;;  %v194_v0 = vadd.f32 %v452_v10, %v193_v60 }
  0xe6   :  { %v345_v61 = vpack.c.bf16 %v211_v51, %v211_v51  ;;  %v212_v63 = vmul.f32 5.656854, %v170_v53  ;;  %v353_v1 = vpack.c.bf16 %v219_v56, %v219_v56  ;;  %v220_v3 = vmul.f32 5.656854, %v202_v58 }
  0xe7   :  { %v343_v2 = vpack.c.bf16 %v209_v57, %v209_v57  ;;  %v210_v4 = vmul.f32 5.656854, %v162_v59  ;;  %v351_v5 = vpack.c.bf16 %v217_v62, %v217_v62  ;;  %v218_v7 = vmul.f32 5.656854, %v194_v0 }
  0xe8   :  { %292 = vst.msk [vmem:[%s537_s3 + $0x18] sm:$0xf] %vm285_vm2, %v345_v61  ;;  %v346_v6 = vpack.c.bf16 %v212_v63, %v212_v63  ;;  %300 = vst.msk [vmem:[%s537_s3 + $0x38] sm:$0xf] %vm285_vm2, %v353_v1  ;;  %v354_v8 = vpack.c.bf16 %v220_v3, %v220_v3 }
  0xe9   :  { %290 = vst.msk [vmem:[%s537_s3 + $0x10] sm:$0xf] %vm285_vm2, %v343_v2  ;;  %v344_v9 = vpack.c.bf16 %v210_v4, %v210_v4  ;;  %298 = vst.msk [vmem:[%s537_s3 + $0x30] sm:$0xf] %vm285_vm2, %v351_v5  ;;  %v352_v10 = vpack.c.bf16 %v218_v7, %v218_v7 }
  0xea   :  { %293 = vst.msk [vmem:[%s537_s3 + $0x1c] sm:$0xf] %vm285_vm2, %v346_v6  ;;  %301 = vst.msk [vmem:[%s537_s3 + $0x3c] sm:$0xf] %vm285_vm2, %v354_v8 }
  0xeb   :  { %291 = vst.msk [vmem:[%s537_s3 + $0x14] sm:$0xf] %vm285_vm2, %v344_v9  ;;  %299 = vst.msk [vmem:[%s537_s3 + $0x34] sm:$0xf] %vm285_vm2, %v352_v10 }

</bundles_post_ra>
